<compile_context>
chip_gen: v6e
topology: v6e:2x2x1
jax: 0.10.0
libtpu: 0.0.40
codegen_flags: <defaults>
</compile_context>

<pallas_src>
import functools

import jax
import jax.numpy as jnp
from jax.experimental import pallas as pl
from jax.experimental.pallas import tpu as pltpu

LANE = 128      # vreg lane width (last dim)
SUBLANE = 8     # vreg sublane width (second-to-last dim)


def _round_up(x, m):
    return ((x + m - 1) // m) * m


def _mlp_kernel(num_args, compute_dtype, *refs):
    """refs = (x_0 .. x_{A-1}, w1, b1, w2, b2, o)."""
    x_refs = refs[:num_args]
    w1_ref, b1_ref, w2_ref, b2_ref, o_ref = refs[num_args:]

    # Fused concat in VMEM (XLU lane concat; the concatenated tensor never
    # touches HBM), then a single first-layer MXU pass with f32 accumulation.
    if num_args == 1:
        x = x_refs[0][...]
    else:
        x = jnp.concatenate([r[...] for r in x_refs], axis=-1)
    x = x.astype(compute_dtype)

    h = jnp.dot(x, w1_ref[...], preferred_element_type=jnp.float32)
    h = jnp.maximum(h + b1_ref[...], 0.0)                 # bias add + ReLU in f32

    y = jnp.dot(h.astype(compute_dtype), w2_ref[...],
                preferred_element_type=jnp.float32) + b2_ref[...]
    o_ref[...] = y.astype(o_ref.dtype)


def init_params(key, in_size, hidden_size, out_size, dtype=jnp.float32):
    """Synthetic params mirroring nn.Linear (stored transposed: [in, out])."""
    k1, k2, k3, k4 = jax.random.split(key, 4)
    s1 = 1.0 / jnp.sqrt(in_size)
    s2 = 1.0 / jnp.sqrt(hidden_size)
    w1 = jax.random.uniform(k1, (in_size, hidden_size), dtype, -s1, s1)
    b1 = jax.random.uniform(k2, (hidden_size,), dtype, -s1, s1)
    w2 = jax.random.uniform(k3, (hidden_size, out_size), dtype, -s2, s2)
    b2 = jax.random.uniform(k4, (out_size,), dtype, -s2, s2)
    return w1, b1, w2, b2


def prepare_params(w1, b1, w2, b2, compute_dtype=jnp.float32):
    """Pad the hidden axis to a lane multiple; leave the output axis unpadded.

    Weights are cast to `compute_dtype` (bf16 is valid on v5e/v6e/v7x: the MXU
    is bf16-native on every generation; bias adds and ReLU stay in f32).
    Padded hidden cols of W1/b1 are zero (relu -> 0) and the matching padded W2
    rows are zero, so results are unchanged.
    """
    in_size, hidden = w1.shape
    hp = _round_up(hidden, LANE)
    w1p = jnp.pad(w1, ((0, 0), (0, hp - hidden))).astype(compute_dtype)
    b1p = jnp.pad(b1.reshape(1, -1), ((0, 0), (0, hp - hidden))).astype(jnp.float32)
    w2p = jnp.pad(w2, ((0, hp - hidden), (0, 0))).astype(compute_dtype)
    b2p = b2.reshape(1, -1).astype(jnp.float32)
    return w1p, b1p, w2p, b2p


def _vmem_capacity_bytes():
    try:
        return int(pltpu.get_tpu_info().vmem_capacity_bytes)
    except Exception:
        return 64 * 1024 * 1024          # conservative default (v7x per-TC)


def multi_arg_mlp(prepared, *args, tm_cap=1024):
    """Pallas implementation of MultiArgMLP.forward(*args)."""
    w1, b1, w2, b2 = prepared
    num_args = len(args)
    n = args[0].shape[0]
    assert all(a.shape[0] == n for a in args)
    in_dims = [a.shape[1] for a in args]
    in_size = sum(in_dims)
    assert w1.shape[0] == in_size, "arg feature dims must sum to in_size"
    hp = w1.shape[1]
    out_size = w2.shape[1]
    x_dtype = args[0].dtype
    compute_dtype = w1.dtype
    x_item = jnp.dtype(x_dtype).itemsize
    c_item = jnp.dtype(compute_dtype).itemsize

    vmem_cap = _vmem_capacity_bytes()

    # Resident constant-weight bytes (x2 budgeted in case single-buffering
    # falls back to default double-buffered specs).
    resident = 2 * ((in_size * hp + hp * out_size) * c_item + (hp + out_size) * 4)
    # Per-row VMEM: double-buffered input/output tiles + ~3x slack for the f32
    # intermediates the body materializes (concat x, acc, h, bf16 cast of h, y).
    per_row = (2 * in_size * x_item + 2 * out_size * x_item
               + 3 * (in_size * c_item + 2 * hp * 4 + hp * c_item + 2 * out_size * 4))
    budget = int(0.45 * vmem_cap)
    tm_max = (budget - resident) // max(per_row, 1)
    tm_max = max(SUBLANE, min(tm_cap, (tm_max // SUBLANE) * SUBLANE))

    # >=2 row tiles (when the batch allows) so the single "parallel" axis can
    # shard across v7x's two TensorCores; tm picked to minimize batch-pad waste.
    min_tiles = 2 if n >= 2 * SUBLANE else 1
    ntiles = max(pl.cdiv(n, tm_max), min_tiles)
    tm = _round_up(pl.cdiv(n, ntiles), SUBLANE)
    ntiles = max(pl.cdiv(n, tm), 1)
    n_pad = ntiles * tm
    if n_pad != n:
        args = tuple(jnp.pad(a, ((0, n_pad - n), (0, 0))) for a in args)

    kernel = functools.partial(_mlp_kernel, num_args, compute_dtype)

    flops = 2 * n_pad * (in_size * hp + hp * out_size)
    bytes_accessed = (n_pad * in_size * x_item
                      + (in_size * hp + hp * out_size) * c_item
                      + (hp + out_size) * 4
                      + n_pad * out_size * x_item)
    cost = pl.CostEstimate(flops=flops, transcendentals=0,
                           bytes_accessed=bytes_accessed)

    # Generation-aware scoped-VMEM limit: always set (v5e default is only
    # 16 MiB) but never above ~75% of physical VMEM (v7x has only 64 MiB).
    vmem_est = resident + tm * per_row
    vmem_limit = int(min(0.75 * vmem_cap, max(2 * vmem_est, 32 * 1024 * 1024)))

    def build(single_buffer_consts):
        const_kw = (dict(pipeline_mode=pl.Buffered(1))
                    if single_buffer_consts else {})
        in_specs = [pl.BlockSpec((tm, d), lambda i: (i, 0)) for d in in_dims]
        in_specs += [
            pl.BlockSpec((in_size, hp), lambda i: (0, 0), **const_kw),    # W1
            pl.BlockSpec((1, hp), lambda i: (0, 0), **const_kw),          # b1
            pl.BlockSpec((hp, out_size), lambda i: (0, 0), **const_kw),   # W2
            pl.BlockSpec((1, out_size), lambda i: (0, 0), **const_kw),    # b2
        ]
        out_spec = pl.BlockSpec((tm, out_size), lambda i: (i, 0))
        return pl.pallas_call(
            kernel,
            out_shape=jax.ShapeDtypeStruct((n_pad, out_size), x_dtype),
            grid_spec=pltpu.PrefetchScalarGridSpec(
                num_scalar_prefetch=0,
                grid=(ntiles,),
                in_specs=in_specs,
                out_specs=out_spec,
            ),
            compiler_params=pltpu.CompilerParams(
                dimension_semantics=("parallel",),
                vmem_limit_bytes=vmem_limit,
            ),
            cost_estimate=cost,
        )

    try:
        out = build(True)(*args, w1, b1, w2, b2)
    except Exception:
        # Some Pallas versions reject pl.Buffered(1) on inputs; retry default.
        out = build(False)(*args, w1, b1, w2, b2)

    return out if n_pad == n else out[:n]


def _reference(params, *args):
    w1, b1, w2, b2 = params
    x = jnp.concatenate(args, axis=1)
    h = jnp.maximum(x @ w1 + b1.reshape(1, -1), 0.0)
    return h @ w2 + b2.reshape(1, -1)


if __name__ == "__main__":
    key = jax.random.PRNGKey(0)
    kp, kx1, kx2 = jax.random.split(key, 3)

    # Small shapes consistent with MultiArgMLP(in_size, hidden_size, out_size)
    batch = 16
    d1, d2 = 8, 8               # two *args concatenated along dim=1
    in_size = d1 + d2           # 16
    hidden_size = 32
    out_size = 16

    params = init_params(kp, in_size, hidden_size, out_size)
    x1 = jax.random.normal(kx1, (batch, d1), jnp.float32)
    x2 = jax.random.normal(kx2, (batch, d2), jnp.float32)

    # f32 path (exact semantics of the torch module).
    prep_f32 = prepare_params(*params, compute_dtype=jnp.float32)
    out = jax.block_until_ready(multi_arg_mlp(prep_f32, x1, x2))
    ref = _reference(params, x1, x2)
    assert out.shape == (batch, out_size)
    assert jnp.allclose(out, ref, atol=1e-4, rtol=1e-4), \
        float(jnp.max(jnp.abs(out - ref)))

    # bf16-operand path (valid on v5e/v6e/v7x) with a non-divisible batch size.
    n2 = 19
    x1b = jax.random.normal(jax.random.PRNGKey(1), (n2, d1), jnp.float32)
    x2b = jax.random.normal(jax.random.PRNGKey(2), (n2, d2), jnp.float32)
    prep_bf16 = prepare_params(*params, compute_dtype=jnp.bfloat16)
    out16 = jax.block_until_ready(multi_arg_mlp(prep_bf16, x1b, x2b))
    ref16 = _reference(params, x1b, x2b)
    assert out16.shape == (n2, out_size)
    assert jnp.allclose(out16, ref16, atol=5e-2, rtol=5e-2), \
        float(jnp.max(jnp.abs(out16 - ref16)))

    print("KERNEL_OK")
</pallas_src>

<mosaic_0001>
module attributes {stable_mosaic.version = 11 : i64} {
  func.func @_mlp_kernel(%arg0: i32, %arg1: memref<8x8xf32, #tpu.memory_space<vmem>>, %arg2: memref<8x8xf32, #tpu.memory_space<vmem>>, %arg3: memref<16x128xf32, #tpu.memory_space<vmem>>, %arg4: memref<1x128xf32, #tpu.memory_space<vmem>>, %arg5: memref<128x16xf32, #tpu.memory_space<vmem>>, %arg6: memref<1x16xf32, #tpu.memory_space<vmem>>, %arg7: memref<8x16xf32, #tpu.memory_space<vmem>>) attributes {dimension_semantics = [#tpu.dimension_semantics<parallel>], iteration_bounds = array<i64: 2>, scalar_prefetch = 0 : i64, scratch_operands = 0 : i64, tpu.core_type = #tpu.core_type<tc>, window_params = [{transform_indices = @transform_0, window_bounds = array<i64: 8, 8>}, {transform_indices = @transform_1, window_bounds = array<i64: 8, 8>}, {pipeline_mode = #tpu.pipeline_mode<synchronous>, transform_indices = @transform_2, window_bounds = array<i64: 16, 128>}, {pipeline_mode = #tpu.pipeline_mode<synchronous>, transform_indices = @transform_3, window_bounds = array<i64: 1, 128>}, {pipeline_mode = #tpu.pipeline_mode<synchronous>, transform_indices = @transform_4, window_bounds = array<i64: 128, 16>}, {pipeline_mode = #tpu.pipeline_mode<synchronous>, transform_indices = @transform_5, window_bounds = array<i64: 1, 16>}, {transform_indices = @transform_6, window_bounds = array<i64: 8, 16>}]} {
    %c0 = arith.constant 0 : index
    %c0_0 = arith.constant 0 : index
    %0 = vector.load %arg1[%c0, %c0_0] : memref<8x8xf32, #tpu.memory_space<vmem>>, vector<8x8xf32>
    %c0_1 = arith.constant 0 : index
    %c0_2 = arith.constant 0 : index
    %1 = vector.load %arg2[%c0_1, %c0_2] : memref<8x8xf32, #tpu.memory_space<vmem>>, vector<8x8xf32>
    %2 = tpu.concatenate %0, %1 in 1 : vector<8x8xf32>, vector<8x8xf32> -> vector<8x16xf32>
    %c0_3 = arith.constant 0 : index
    %c0_4 = arith.constant 0 : index
    %3 = vector.load %arg3[%c0_3, %c0_4] : memref<16x128xf32, #tpu.memory_space<vmem>>, vector<16x128xf32>
    %cst = arith.constant dense<0.000000e+00> : vector<8x128xf32>
    %4 = tpu.matmul %2, %3, %cst {dimension_numbers = #tpu.dot_dimension_numbers<[1], [0], [0], [1], [0, 0, 1, 1], [], []>} : vector<8x16xf32>, vector<16x128xf32>, vector<8x128xf32> -> vector<8x128xf32>
    %c0_5 = arith.constant 0 : index
    %c0_6 = arith.constant 0 : index
    %5 = vector.load %arg4[%c0_5, %c0_6] : memref<1x128xf32, #tpu.memory_space<vmem>>, vector<1x128xf32>
    %6 = vector.broadcast %5 : vector<1x128xf32> to vector<8x128xf32>
    %7 = arith.addf %4, %6 : vector<8x128xf32>
    %cst_7 = arith.constant 0.000000e+00 : f32
    %8 = vector.broadcast %cst_7 : f32 to vector<8x128xf32>
    %9 = arith.maximumf %7, %8 : vector<8x128xf32>
    %c0_8 = arith.constant 0 : index
    %c0_9 = arith.constant 0 : index
    %10 = vector.load %arg5[%c0_8, %c0_9] : memref<128x16xf32, #tpu.memory_space<vmem>>, vector<128x16xf32>
    %cst_10 = arith.constant dense<0.000000e+00> : vector<8x16xf32>
    %11 = tpu.matmul %9, %10, %cst_10 {dimension_numbers = #tpu.dot_dimension_numbers<[1], [0], [0], [1], [0, 0, 1, 1], [], []>} : vector<8x128xf32>, vector<128x16xf32>, vector<8x16xf32> -> vector<8x16xf32>
    %c0_11 = arith.constant 0 : index
    %c0_12 = arith.constant 0 : index
    %12 = vector.load %arg6[%c0_11, %c0_12] : memref<1x16xf32, #tpu.memory_space<vmem>>, vector<1x16xf32>
    %13 = vector.broadcast %12 : vector<1x16xf32> to vector<8x16xf32>
    %14 = arith.addf %11, %13 : vector<8x16xf32>
    %c0_13 = arith.constant 0 : index
    %c0_14 = arith.constant 0 : index
    %15 = vector.load %arg7[%c0_13, %c0_14] : memref<8x16xf32, #tpu.memory_space<vmem>>, vector<8x16xf32>
    tpu.vector_store %arg7[%c0_13, %c0_14], %14 {strides = array<i32>} : memref<8x16xf32, #tpu.memory_space<vmem>>, vector<8x16xf32>,
    return
  }
  func.func @transform_0(%arg0: i32) -> (i32, i32) {
    %c0_i32 = arith.constant 0 : i32
    %c0_i32_0 = arith.constant 0 : i32
    return %arg0, %c0_i32 : i32, i32
  }
  func.func @transform_1(%arg0: i32) -> (i32, i32) {
    %c0_i32 = arith.constant 0 : i32
    %c0_i32_0 = arith.constant 0 : i32
    return %arg0, %c0_i32 : i32, i32
  }
  func.func @transform_2(%arg0: i32) -> (i32, i32) {
    %c0_i32 = arith.constant 0 : i32
    %c0_i32_0 = arith.constant 0 : i32
    %c0_i32_1 = arith.constant 0 : i32
    return %c0_i32, %c0_i32_0 : i32, i32
  }
  func.func @transform_3(%arg0: i32) -> (i32, i32) {
    %c0_i32 = arith.constant 0 : i32
    %c0_i32_0 = arith.constant 0 : i32
    %c0_i32_1 = arith.constant 0 : i32
    return %c0_i32, %c0_i32_0 : i32, i32
  }
  func.func @transform_4(%arg0: i32) -> (i32, i32) {
    %c0_i32 = arith.constant 0 : i32
    %c0_i32_0 = arith.constant 0 : i32
    %c0_i32_1 = arith.constant 0 : i32
    return %c0_i32, %c0_i32_0 : i32, i32
  }
  func.func @transform_5(%arg0: i32) -> (i32, i32) {
    %c0_i32 = arith.constant 0 : i32
    %c0_i32_0 = arith.constant 0 : i32
    %c0_i32_1 = arith.constant 0 : i32
    return %c0_i32, %c0_i32_0 : i32, i32
  }
  func.func @transform_6(%arg0: i32) -> (i32, i32) {
    %c0_i32 = arith.constant 0 : i32
    %c0_i32_0 = arith.constant 0 : i32
    return %arg0, %c0_i32 : i32, i32
  }
}

module attributes {stable_mosaic.version = 11 : i64} {
  func.func @_mlp_kernel(%arg0: i32, %arg1: memref<8x8xf32, #tpu.memory_space<vmem>>, %arg2: memref<8x8xf32, #tpu.memory_space<vmem>>, %arg3: memref<16x128xf32, #tpu.memory_space<vmem>>, %arg4: memref<1x128xf32, #tpu.memory_space<vmem>>, %arg5: memref<128x16xf32, #tpu.memory_space<vmem>>, %arg6: memref<1x16xf32, #tpu.memory_space<vmem>>, %arg7: memref<8x16xf32, #tpu.memory_space<vmem>>) attributes {dimension_semantics = [#tpu.dimension_semantics<parallel>], iteration_bounds = array<i64: 2>, scalar_prefetch = 0 : i64, scratch_operands = 0 : i64, tpu.core_type = #tpu.core_type<tc>, window_params = [{transform_indices = @transform_0, window_bounds = array<i64: 8, 8>}, {transform_indices = @transform_1, window_bounds = array<i64: 8, 8>}, {pipeline_mode = #tpu.pipeline_mode<synchronous>, transform_indices = @transform_2, window_bounds = array<i64: 16, 128>}, {pipeline_mode = #tpu.pipeline_mode<synchronous>, transform_indices = @transform_3, window_bounds = array<i64: 1, 128>}, {pipeline_mode = #tpu.pipeline_mode<synchronous>, transform_indices = @transform_4, window_bounds = array<i64: 128, 16>}, {pipeline_mode = #tpu.pipeline_mode<synchronous>, transform_indices = @transform_5, window_bounds = array<i64: 1, 16>}, {transform_indices = @transform_6, window_bounds = array<i64: 8, 16>}]} {
    %c0 = arith.constant 0 : index
    %c0_0 = arith.constant 0 : index
    %0 = vector.load %arg1[%c0, %c0_0] : memref<8x8xf32, #tpu.memory_space<vmem>>, vector<8x8xf32>
    %c0_1 = arith.constant 0 : index
    %c0_2 = arith.constant 0 : index
    %1 = vector.load %arg2[%c0_1, %c0_2] : memref<8x8xf32, #tpu.memory_space<vmem>>, vector<8x8xf32>
    %2 = tpu.concatenate %0, %1 in 1 : vector<8x8xf32>, vector<8x8xf32> -> vector<8x16xf32>
    %c0_3 = arith.constant 0 : index
    %c0_4 = arith.constant 0 : index
    %3 = vector.load %arg3[%c0_3, %c0_4] : memref<16x128xf32, #tpu.memory_space<vmem>>, vector<16x128xf32>
    %cst = arith.constant dense<0.000000e+00> : vector<8x128xf32>
    %4 = tpu.matmul %2, %3, %cst {dimension_numbers = #tpu.dot_dimension_numbers<[1], [0], [0], [1], [0, 0, 1, 1], [], []>} : vector<8x16xf32>, vector<16x128xf32>, vector<8x128xf32> -> vector<8x128xf32>
    %c0_5 = arith.constant 0 : index
    %c0_6 = arith.constant 0 : index
    %5 = vector.load %arg4[%c0_5, %c0_6] : memref<1x128xf32, #tpu.memory_space<vmem>>, vector<1x128xf32>
    %6 = vector.broadcast %5 : vector<1x128xf32> to vector<8x128xf32>
    %7 = arith.addf %4, %6 : vector<8x128xf32>
    %cst_7 = arith.constant 0.000000e+00 : f32
    %8 = vector.broadcast %cst_7 : f32 to vector<8x128xf32>
    %9 = arith.maximumf %7, %8 : vector<8x128xf32>
    %c0_8 = arith.constant 0 : index
    %c0_9 = arith.constant 0 : index
    %10 = vector.load %arg5[%c0_8, %c0_9] : memref<128x16xf32, #tpu.memory_space<vmem>>, vector<128x16xf32>
    %cst_10 = arith.constant dense<0.000000e+00> : vector<8x16xf32>
    %11 = tpu.matmul %9, %10, %cst_10 {dimension_numbers = #tpu.dot_dimension_numbers<[1], [0], [0], [1], [0, 0, 1, 1], [], []>} : vector<8x128xf32>, vector<128x16xf32>, vector<8x16xf32> -> vector<8x16xf32>
    %c0_11 = arith.constant 0 : index
    %c0_12 = arith.constant 0 : index
    %12 = vector.load %arg6[%c0_11, %c0_12] : memref<1x16xf32, #tpu.memory_space<vmem>>, vector<1x16xf32>
    %13 = vector.broadcast %12 : vector<1x16xf32> to vector<8x16xf32>
    %14 = arith.addf %11, %13 : vector<8x16xf32>
    %c0_13 = arith.constant 0 : index
    %c0_14 = arith.constant 0 : index
    %15 = vector.load %arg7[%c0_13, %c0_14] : memref<8x16xf32, #tpu.memory_space<vmem>>, vector<8x16xf32>
    tpu.vector_store %arg7[%c0_13, %c0_14], %14 {strides = array<i32>} : memref<8x16xf32, #tpu.memory_space<vmem>>, vector<8x16xf32>,
    return
  }
  func.func @transform_0(%arg0: i32) -> (i32, i32) {
    %c0_i32 = arith.constant 0 : i32
    %c0_i32_0 = arith.constant 0 : i32
    return %arg0, %c0_i32 : i32, i32
  }
  func.func @transform_1(%arg0: i32) -> (i32, i32) {
    %c0_i32 = arith.constant 0 : i32
    %c0_i32_0 = arith.constant 0 : i32
    return %arg0, %c0_i32 : i32, i32
  }
  func.func @transform_2(%arg0: i32) -> (i32, i32) {
    %c0_i32 = arith.constant 0 : i32
    %c0_i32_0 = arith.constant 0 : i32
    %c0_i32_1 = arith.constant 0 : i32
    return %c0_i32, %c0_i32_0 : i32, i32
  }
  func.func @transform_3(%arg0: i32) -> (i32, i32) {
    %c0_i32 = arith.constant 0 : i32
    %c0_i32_0 = arith.constant 0 : i32
    %c0_i32_1 = arith.constant 0 : i32
    return %c0_i32, %c0_i32_0 : i32, i32
  }
  func.func @transform_4(%arg0: i32) -> (i32, i32) {
    %c0_i32 = arith.constant 0 : i32
    %c0_i32_0 = arith.constant 0 : i32
    %c0_i32_1 = arith.constant 0 : i32
    return %c0_i32, %c0_i32_0 : i32, i32
  }
  func.func @transform_5(%arg0: i32) -> (i32, i32) {
    %c0_i32 = arith.constant 0 : i32
    %c0_i32_0 = arith.constant 0 : i32
    %c0_i32_1 = arith.constant 0 : i32
    return %c0_i32, %c0_i32_0 : i32, i32
  }
  func.func @transform_6(%arg0: i32) -> (i32, i32) {
    %c0_i32 = arith.constant 0 : i32
    %c0_i32_0 = arith.constant 0 : i32
    return %arg0, %c0_i32 : i32, i32
  }
}

</mosaic_0001>

<bundles_post_ra>
// kernel: tpu_custom_call.1
= control target key start
LH: loop header
LB: loop body
LE: loop exit
PB: predicated region body
PF: predicated region fallthrough
CT: control target
= control target key end

     0   :  { %11 = vsyncpa [#allocation3], 0  ;;  %s939_s0 = inlined_call_operand.vmem [shape: f32[16,8], index: 0, kind: input, shape index: {}]   ;;  %s940_s1 = inlined_call_operand.vmem [shape: f32[16,8], index: 1, kind: input, shape index: {}]   ;;  %s941_s2 = inlined_call_operand.vmem [shape: f32[16,128], index: 2, kind: input, shape index: {}]   ;;  %s942_s3 = inlined_call_operand.vmem [shape: f32[1,128], index: 3, kind: input, shape index: {}]   ;;  %s943_s4 = inlined_call_operand.vmem [shape: f32[128,16], index: 4, kind: input, shape index: {}]   ;;  %s944_s5 = inlined_call_operand.vmem [shape: f32[1,16], index: 5, kind: input, shape index: {}]   ;;  %s945_s6 = inlined_call_operand.hbm [shape: f32[16,16], index: 6, kind: output, shape index: {}]  }
   0x1   :  { %13 = vsyncpa [#allocation3 + $0x1], 0  ;;  %s754_s21 = smov 0   ;;  %s756_s22 = smov 0  }
   0x2   :  { %s758_s23 = smov 0   ;;  %s760_s24 = smov 0  }
   0x3 LB: > { %s775_s25 = sadd.s32 4294967295, %s713_s24   ;;  %s535_s26 = sadd.s32 4294967294, %s713_s24   ;;  %s713_s24 = sphi %s760_s24, %s951_s24   ;;  %s709_s23 = sphi %s758_s23, %s950_s23   ;;  %s705_s22 = sphi %s756_s22, %s949_s22   ;;  %s701_s21 = sphi %s754_s21, %s948_s21  }
   0x4   : > { %s779_s27 = sadd.s32 1, %s713_s24   ;;  %s162_s28 = sadd.s32 1, %s709_s23 }
   0x5   : > { %s159_s29 = ssub.s32 %s713_s24, %s779_s27  ;;  %p172_p0 = scmp.ne.s32.totalorder %s709_s23, %s705_s22 }
   0x6   : > { %p160_p1 = scmp.eq.s32.totalorder %s159_s29, 0  ;;  %p173_p2 = scmp.eq.s32.totalorder %s775_s25, 1 }
   0x7   : > { %p178_p3 = scmp.ne.s32.totalorder %s705_s22, %s701_s21  ;;  %p179_p4 = scmp.eq.s32.totalorder %s535_s26, 1 }
   0x8   : > { %s790_s30 = scalar_select %p160_p1, %s709_s23, %s162_s28  }
   0x9   : > { %p792_p5 = por %p173_p2, %p172_p0  ;;  %p796_p6 = por %p179_p4, %p178_p3 }
   0xa   : > { %p538_p7 = scmp.ge.s32.totalorder %s713_s24, 1  ;;  %p223_p8 = scmp.lt.s32.totalorder %s713_s24, 3 }
   0xc   : > { %p224_p9 = pnand %p538_p7, %p223_p8 }
   0xd   : > { %p256_p10 = scmp.lt.s32.totalorder (!%p224_p9), %s775_s25, 1  ;;  %s717_s11 = smov (!%p224_p9), 8  }
   0xe   : > { %227 = sbr.rel (%p224_p9) target bundleno = 546 (0x222), region = 44  ;;  %s253_s13 = sand.u32 (!%p224_p9), 1, %s705_s22  }
   0xf   : > { %s539_s14 = sshll.u32 (!%p224_p9), %s253_s13, 3  ;;  %s546_s19 = sshll.u32 (!%p224_p9), %s775_s25, 7 }
  0x10   : > { %s255_s20 = scalar_lea.vmem (!%p224_p9), [#allocation2], %s539_s14  ;;  %s451_s9 = scalar_lea.sflag (!%p224_p9), [#allocation3], %s253_s13 }
  0x13   : > { %v273_v0 = vld [vmem:[%s941_s2 + $0x8] sm:$0xff]  ;;  %v715_v1 = vmov 0.0   ;;  %v272_v2 = vld [vmem:[%s941_s2] sm:$0xff]  ;;  %v371_v3 = vld [vmem:[%s943_s4 + $0x78] sm:$0xff]  ;;  %s815_s15 = scalar_select %p256_p10, %s775_s25, 1  ;;  %vm716_vm0 = vmmov 0  }
  0x14   : > { %569 = vmatprep.subr.mxu0 %v715_v1  ;;  %576 = vmatprep.subr.mxu1 %v715_v1  ;;  %v370_v4 = vld [vmem:[%s943_s4 + $0x70] sm:$0xff]  ;;  %v369_v5 = vld [vmem:[%s943_s4 + $0x68] sm:$0xff]  ;;  %v368_v7 = vld [vmem:[%s943_s4 + $0x60] sm:$0xff]  ;;  %vm270_vm1 = vcmask 64512   ;;  %vm281_vm2 = vcmask 130048   ;;  %s718_s25 = smov [#allocation2]  }
  0x15   : > { %570 = vmatpush3.msra.mxu0 %v273_v0  ;;  %573 = vmatprep.mubr.msk.f32.mxu0 %vm716_vm0, %v715_v1  ;;  %s540_s18 = sshll.u32 %s815_s15, 3  ;;  %v367_v8 = vld [vmem:[%s943_s4 + $0x58] sm:$0xff]  ;;  %v366_v9 = vld [vmem:[%s943_s4 + $0x50] sm:$0xff]  ;;  %v365_v10 = vld [vmem:[%s943_s4 + $0x48] sm:$0xff]  ;;  %s903_s15 = scalar_lea.hbm %s945_s6, %s546_s19 }
  0x16   : > { %571 = vmatprep.subr.mxu0 %v715_v1  ;;  %577 = vmatpush3.msra.mxu1 %v371_v3  ;;  %s263_s29 = scalar_lea.vmem %s940_s1, %s540_s18  ;;  %v364_v11 = vld [vmem:[%s943_s4 + $0x40] sm:$0xff]  ;;  %v363_v12 = vld [vmem:[%s943_s4 + $0x38] sm:$0xff]  ;;  %v362_v13 = vld [vmem:[%s943_s4 + $0x30] sm:$0xff]  ;;  %s259_s26 = scalar_lea.vmem %s939_s0, %s540_s18 }
  0x17   : > { %572 = vmatpush3.msra.mxu0 %v272_v2  ;;  %578 = vmatprep.subr.mxu1 %v715_v1  ;;  %v265_v6 = vld [vmem:[%s263_s29] sm:$0xff]  ;;  %v361_v14 = vld [vmem:[%s943_s4 + $0x28] sm:$0xff]  ;;  %v359_v16 = vld [vmem:[%s943_s4 + $0x18] sm:$0xff]  ;;  %s657_s10 = sshll.u32 %s718_s25, 4  ;;  %s658_s10 = int_to_ptr.vmem [resolvable:$false] %s657_s10 }
  0x18   : > { %579 = vmatpush3.msra.mxu1 %v370_v4  ;;  %608 = vmatprep.mubr.msk.f32.mxu1 %vm716_vm0, %v715_v1  ;;  %v360_v15 = vld [vmem:[%s943_s4 + $0x20] sm:$0xff]  ;;  %v358_v20 = vld [vmem:[%s943_s4 + $0x10] sm:$0xff]  ;;  %v357_v21 = vld [vmem:[%s943_s4 + $0x8] sm:$0xff] }
  0x19   : > { %580 = vmatprep.subr.mxu1 %v715_v1  ;;  %267 = vrot.lane.b32.xlu0 %v265_v6, %s717_s11  ;;  %v264_v17 = vld [vmem:[%s259_s26] sm:$0xff]  ;;  %s464_s26 = sshll.u32 %s255_s20, 4  ;;  %s659_s11 = scalar_lea.vmem %s658_s10, 256  ;;  %s465_s26 = int_to_ptr.vmem [resolvable:$true] %s464_s26 }
  0x1a   : > { %581 = vmatpush3.msra.mxu1 %v369_v5  ;;  %v356_v22 = vld [vmem:[%s943_s4] sm:$0xff]  ;;  %s653_s18 = scalar_lea.vmem %s465_s26, 128  ;;  %p660_p0 = scmp.lt.s32.totalorder %s465_s26, %s658_s10 }
  0x1b   : > { %582 = vmatprep.subr.mxu1 %v715_v1  ;;  %v542_v23 = vld [vmem:[%s942_s3] ss:$0 sm:$0xff]  ;;  %p654_p11 = scmp.ne.s32.totalorder %s465_s26, %s653_s18  ;;  %p661_p1 = scmp.lt.s32.totalorder %s659_s11, %s653_s18 }
  0x1c   : > { %583 = vmatpush3.msra.mxu1 %v368_v7  ;;  %v544_v28 = vld [vmem:[%s944_s5] ss:$0 sm:$0xff] }
  0x1d   : > { %584 = vmatprep.subr.mxu1 %v715_v1  ;;  %p655_p12 = pnand %p654_p11, %p792_p5  ;;  %p662_p2 = por %p661_p1, %p660_p0 }
  0x1e   : > { %585 = vmatpush3.msra.mxu1 %v367_v8 }
  0x1f   : > { %586 = vmatprep.subr.mxu1 %v715_v1  ;;  %p656_p13 = pneg %p655_p12 }
  0x20   : > { %587 = vmatpush3.msra.mxu1 %v366_v9 }
  0x21   : > { %588 = vmatprep.subr.mxu1 %v715_v1  ;;  %p663_p3 = pnand %p662_p2, %p656_p13 }
  0x22   : > { %589 = vmatpush3.msra.mxu1 %v365_v10 }
  0x23   : > { %590 = vmatprep.subr.mxu1 %v715_v1 }
  0x24   : > { %591 = vmatpush3.msra.mxu1 %v364_v11 }
  0x25   : > { %592 = vmatprep.subr.mxu1 %v715_v1 }
  0x26   : > { %593 = vmatpush3.msra.mxu1 %v363_v12 }
  0x27   : > { %594 = vmatprep.subr.mxu1 %v715_v1 }
  0x28   : > { %595 = vmatpush3.msra.mxu1 %v362_v13 }
  0x29   : > { %596 = vmatprep.subr.mxu1 %v715_v1 }
  0x2a   : > { %597 = vmatpush3.msra.mxu1 %v361_v14 }
  0x2b   : > { %598 = vmatprep.subr.mxu1 %v715_v1 }
  0x2c   : > { %599 = vmatpush3.msra.mxu1 %v360_v15 }
  0x2d   : > { %600 = vmatprep.subr.mxu1 %v715_v1 }
  0x2e   : > { %601 = vmatpush3.msra.mxu1 %v359_v16 }
  0x2f   : > { %602 = vmatprep.subr.mxu1 %v715_v1 }
  0x30   : > { %603 = vmatpush3.msra.mxu1 %v358_v20 }
  0x31   : > { %604 = vmatprep.subr.mxu1 %v715_v1 }
  0x32   : > { %605 = vmatpush3.msra.mxu1 %v357_v21 }
  0x33   : > { %606 = vmatprep.subr.mxu1 %v715_v1 }
  0x34   : > { %607 = vmatpush3.msra.mxu1 %v356_v22 }
  0x8b   : > { %v268_v18 = vpop.permute.xlu0 %267 }
  0x8c   : > { %v271_v19 = vsel %vm270_vm1, %v264_v17, %v268_v18 }
  0x8d   : > { %574 = vmatmul.mubr.msk.f32.vlgmr.msra.gmra.mxu0 %vm281_vm2, %v271_v19 }
 0x14d   : > { %v351_v24 = vpop.f32.mrf.mxu0 }
 0x14e   : > { %v352_v25 = vadd.f32 %v542_v23, %v351_v24 }
 0x14f   : > { %v575_v26 = vpop.f32.mrf.mxu0 }
 0x150   : > { %v355_v27 = vmax.f32 %v352_v25, 0.0 }
 0x152   : > { %609 = vmatmul.mubr.f32.vlgmr.msra.gmra.mxu1 %v355_v27 }
 0x212   : > { %v445_v29 = vpop.f32.mrf.mxu1 }
 0x213   : > { %v446_v30 = vadd.f32 %v544_v28, %v445_v29 }
 0x214   : > { %v610_v31 = vpop.f32.mrf.mxu1 }
 0x215   : > { %449 = vst.msk [vmem:[%s255_s20] sm:$0xff] %vm281_vm2, %v446_v30 }
 0x216   : > { %666 = shalt.err (!%p663_p3)
}
 0x217   : > { %s667_s12 = scalar_lea.hbm %s903_s15, 128  ;;  %s671_s16 = scalar_lea.hbm %s945_s6, 256 }
 0x218   : > { %p668_p4 = scmp.ne.s32.totalorder %s903_s15, %s667_s12  ;;  %p672_p9 = scmp.lt.s32.totalorder %s903_s15, %s945_s6 }
 0x219   : > { %p673_p10 = scmp.lt.s32.totalorder %s671_s16, %s667_s12 }
 0x21a   : > { %p669_p7 = pnand %p668_p4, %p792_p5 }
 0x21b   : > { %p674_p11 = por %p673_p10, %p672_p9 }
 0x21c   : > { %p670_p8 = pneg %p669_p7 }
 0x21e   : > { %p675_p12 = pnand %p674_p11, %p670_p8 }
 0x220   : > { %678 = shalt.err (!%p675_p12)
}
 0x221   : > { %611 = dma.vmem_to_hbm [thread:$0]  (%p792_p5), %s465_s26, 128, %s903_s15, %s451_s9  }
 0x222 PF: > { %p617_p13 = scmp.ge.s32.totalorder %s713_s24, 2  ;;  %s476_s20 = sand.u32 1, %s701_s21  }
 0x223   : > { %s477_s28 = scalar_lea.sflag [#allocation3], %s476_s20 }
 0x224   : > { %p614_p0 = pnand %p617_p13, %p796_p6 }
 0x226   : > { %p615_p1 = pneg %p614_p0 }
 0x228   : > { %696 = dma.done.wait (%p615_p1), %s477_s28, 128  }
 0x229   : > { %698 = vsyncadd (%p615_p1), %s477_s28, 4294967168  ;;  %p16_p2 = scmp.ge.s32.totalorder %s779_s27, 4   ;;  %s948_s21 = smov %s705_s22 }
 0x22a   : > { %s949_s22 = smov %s709_s23  ;;  %s950_s23 = smov %s790_s30 }
 0x22b   : > { %s951_s24 = smov %s779_s27  ;;  %18 = sbr.rel (!%p16_p2) target bundleno = 3 (0x3), region = 82 }
 0x230   :  { %482 = vsyncpa [#allocation3], 1 }
 0x231   :  { %484 = vsyncpa [#allocation3 + $0x1], 1 }

// kernel: tpu_custom_call.1
= control target key start
LH: loop header
LB: loop body
LE: loop exit
PB: predicated region body
PF: predicated region fallthrough
CT: control target
= control target key end

     0   :  { %11 = vsyncpa [#allocation3], 0  ;;  %s939_s0 = inlined_call_operand.vmem [shape: f32[16,8], index: 0, kind: input, shape index: {}]   ;;  %s940_s1 = inlined_call_operand.vmem [shape: f32[16,8], index: 1, kind: input, shape index: {}]   ;;  %s941_s2 = inlined_call_operand.vmem [shape: f32[16,128], index: 2, kind: input, shape index: {}]   ;;  %s942_s3 = inlined_call_operand.vmem [shape: f32[1,128], index: 3, kind: input, shape index: {}]   ;;  %s943_s4 = inlined_call_operand.vmem [shape: f32[128,16], index: 4, kind: input, shape index: {}]   ;;  %s944_s5 = inlined_call_operand.vmem [shape: f32[1,16], index: 5, kind: input, shape index: {}]   ;;  %s945_s6 = inlined_call_operand.hbm [shape: f32[16,16], index: 6, kind: output, shape index: {}]  }
   0x1   :  { %13 = vsyncpa [#allocation3 + $0x1], 0  ;;  %s754_s21 = smov 0   ;;  %s756_s22 = smov 0  }
   0x2   :  { %s758_s23 = smov 0   ;;  %s760_s24 = smov 0  }
   0x3 LB: > { %s775_s25 = sadd.s32 4294967295, %s713_s24   ;;  %s535_s26 = sadd.s32 4294967294, %s713_s24   ;;  %s713_s24 = sphi %s760_s24, %s951_s24   ;;  %s709_s23 = sphi %s758_s23, %s950_s23   ;;  %s705_s22 = sphi %s756_s22, %s949_s22   ;;  %s701_s21 = sphi %s754_s21, %s948_s21  }
   0x4   : > { %s779_s27 = sadd.s32 1, %s713_s24   ;;  %s162_s28 = sadd.s32 1, %s709_s23 }
   0x5   : > { %s159_s29 = ssub.s32 %s713_s24, %s779_s27  ;;  %p172_p0 = scmp.ne.s32.totalorder %s709_s23, %s705_s22 }
   0x6   : > { %p160_p1 = scmp.eq.s32.totalorder %s159_s29, 0  ;;  %p173_p2 = scmp.eq.s32.totalorder %s775_s25, 1 }
   0x7   : > { %p178_p3 = scmp.ne.s32.totalorder %s705_s22, %s701_s21  ;;  %p179_p4 = scmp.eq.s32.totalorder %s535_s26, 1 }
   0x8   : > { %s790_s30 = scalar_select %p160_p1, %s709_s23, %s162_s28  }
   0x9   : > { %p792_p5 = por %p173_p2, %p172_p0  ;;  %p796_p6 = por %p179_p4, %p178_p3 }
   0xa   : > { %p538_p7 = scmp.ge.s32.totalorder %s713_s24, 1  ;;  %p223_p8 = scmp.lt.s32.totalorder %s713_s24, 3 }
   0xc   : > { %p224_p9 = pnand %p538_p7, %p223_p8 }
   0xd   : > { %p256_p10 = scmp.lt.s32.totalorder (!%p224_p9), %s775_s25, 1  ;;  %s717_s11 = smov (!%p224_p9), 8  }
   0xe   : > { %227 = sbr.rel (%p224_p9) target bundleno = 546 (0x222), region = 44  ;;  %s253_s13 = sand.u32 (!%p224_p9), 1, %s705_s22  }
   0xf   : > { %s539_s14 = sshll.u32 (!%p224_p9), %s253_s13, 3  ;;  %s546_s19 = sshll.u32 (!%p224_p9), %s775_s25, 7 }
  0x10   : > { %s255_s20 = scalar_lea.vmem (!%p224_p9), [#allocation2], %s539_s14  ;;  %s451_s9 = scalar_lea.sflag (!%p224_p9), [#allocation3], %s253_s13 }
  0x13   : > { %v273_v0 = vld [vmem:[%s941_s2 + $0x8] sm:$0xff]  ;;  %v715_v1 = vmov 0.0   ;;  %v272_v2 = vld [vmem:[%s941_s2] sm:$0xff]  ;;  %v371_v3 = vld [vmem:[%s943_s4 + $0x78] sm:$0xff]  ;;  %s815_s15 = scalar_select %p256_p10, %s775_s25, 1  ;;  %vm716_vm0 = vmmov 0  }
  0x14   : > { %569 = vmatprep.subr.mxu0 %v715_v1  ;;  %576 = vmatprep.subr.mxu1 %v715_v1  ;;  %v370_v4 = vld [vmem:[%s943_s4 + $0x70] sm:$0xff]  ;;  %v369_v5 = vld [vmem:[%s943_s4 + $0x68] sm:$0xff]  ;;  %v368_v7 = vld [vmem:[%s943_s4 + $0x60] sm:$0xff]  ;;  %vm270_vm1 = vcmask 64512   ;;  %vm281_vm2 = vcmask 130048   ;;  %s718_s25 = smov [#allocation2]  }
  0x15   : > { %570 = vmatpush3.msra.mxu0 %v273_v0  ;;  %573 = vmatprep.mubr.msk.f32.mxu0 %vm716_vm0, %v715_v1  ;;  %s540_s18 = sshll.u32 %s815_s15, 3  ;;  %v367_v8 = vld [vmem:[%s943_s4 + $0x58] sm:$0xff]  ;;  %v366_v9 = vld [vmem:[%s943_s4 + $0x50] sm:$0xff]  ;;  %v365_v10 = vld [vmem:[%s943_s4 + $0x48] sm:$0xff]  ;;  %s903_s15 = scalar_lea.hbm %s945_s6, %s546_s19 }
  0x16   : > { %571 = vmatprep.subr.mxu0 %v715_v1  ;;  %577 = vmatpush3.msra.mxu1 %v371_v3  ;;  %s263_s29 = scalar_lea.vmem %s940_s1, %s540_s18  ;;  %v364_v11 = vld [vmem:[%s943_s4 + $0x40] sm:$0xff]  ;;  %v363_v12 = vld [vmem:[%s943_s4 + $0x38] sm:$0xff]  ;;  %v362_v13 = vld [vmem:[%s943_s4 + $0x30] sm:$0xff]  ;;  %s259_s26 = scalar_lea.vmem %s939_s0, %s540_s18 }
  0x17   : > { %572 = vmatpush3.msra.mxu0 %v272_v2  ;;  %578 = vmatprep.subr.mxu1 %v715_v1  ;;  %v265_v6 = vld [vmem:[%s263_s29] sm:$0xff]  ;;  %v361_v14 = vld [vmem:[%s943_s4 + $0x28] sm:$0xff]  ;;  %v359_v16 = vld [vmem:[%s943_s4 + $0x18] sm:$0xff]  ;;  %s657_s10 = sshll.u32 %s718_s25, 4  ;;  %s658_s10 = int_to_ptr.vmem [resolvable:$false] %s657_s10 }
  0x18   : > { %579 = vmatpush3.msra.mxu1 %v370_v4  ;;  %608 = vmatprep.mubr.msk.f32.mxu1 %vm716_vm0, %v715_v1  ;;  %v360_v15 = vld [vmem:[%s943_s4 + $0x20] sm:$0xff]  ;;  %v358_v20 = vld [vmem:[%s943_s4 + $0x10] sm:$0xff]  ;;  %v357_v21 = vld [vmem:[%s943_s4 + $0x8] sm:$0xff] }
  0x19   : > { %580 = vmatprep.subr.mxu1 %v715_v1  ;;  %267 = vrot.lane.b32.xlu0 %v265_v6, %s717_s11  ;;  %v264_v17 = vld [vmem:[%s259_s26] sm:$0xff]  ;;  %s464_s26 = sshll.u32 %s255_s20, 4  ;;  %s659_s11 = scalar_lea.vmem %s658_s10, 256  ;;  %s465_s26 = int_to_ptr.vmem [resolvable:$true] %s464_s26 }
  0x1a   : > { %581 = vmatpush3.msra.mxu1 %v369_v5  ;;  %v356_v22 = vld [vmem:[%s943_s4] sm:$0xff]  ;;  %s653_s18 = scalar_lea.vmem %s465_s26, 128  ;;  %p660_p0 = scmp.lt.s32.totalorder %s465_s26, %s658_s10 }
  0x1b   : > { %582 = vmatprep.subr.mxu1 %v715_v1  ;;  %v542_v23 = vld [vmem:[%s942_s3] ss:$0 sm:$0xff]  ;;  %p654_p11 = scmp.ne.s32.totalorder %s465_s26, %s653_s18  ;;  %p661_p1 = scmp.lt.s32.totalorder %s659_s11, %s653_s18 }
  0x1c   : > { %583 = vmatpush3.msra.mxu1 %v368_v7  ;;  %v544_v28 = vld [vmem:[%s944_s5] ss:$0 sm:$0xff] }
  0x1d   : > { %584 = vmatprep.subr.mxu1 %v715_v1  ;;  %p655_p12 = pnand %p654_p11, %p792_p5  ;;  %p662_p2 = por %p661_p1, %p660_p0 }
  0x1e   : > { %585 = vmatpush3.msra.mxu1 %v367_v8 }
  0x1f   : > { %586 = vmatprep.subr.mxu1 %v715_v1  ;;  %p656_p13 = pneg %p655_p12 }
  0x20   : > { %587 = vmatpush3.msra.mxu1 %v366_v9 }
  0x21   : > { %588 = vmatprep.subr.mxu1 %v715_v1  ;;  %p663_p3 = pnand %p662_p2, %p656_p13 }
  0x22   : > { %589 = vmatpush3.msra.mxu1 %v365_v10 }
  0x23   : > { %590 = vmatprep.subr.mxu1 %v715_v1 }
  0x24   : > { %591 = vmatpush3.msra.mxu1 %v364_v11 }
  0x25   : > { %592 = vmatprep.subr.mxu1 %v715_v1 }
  0x26   : > { %593 = vmatpush3.msra.mxu1 %v363_v12 }
  0x27   : > { %594 = vmatprep.subr.mxu1 %v715_v1 }
  0x28   : > { %595 = vmatpush3.msra.mxu1 %v362_v13 }
  0x29   : > { %596 = vmatprep.subr.mxu1 %v715_v1 }
  0x2a   : > { %597 = vmatpush3.msra.mxu1 %v361_v14 }
  0x2b   : > { %598 = vmatprep.subr.mxu1 %v715_v1 }
  0x2c   : > { %599 = vmatpush3.msra.mxu1 %v360_v15 }
  0x2d   : > { %600 = vmatprep.subr.mxu1 %v715_v1 }
  0x2e   : > { %601 = vmatpush3.msra.mxu1 %v359_v16 }
  0x2f   : > { %602 = vmatprep.subr.mxu1 %v715_v1 }
  0x30   : > { %603 = vmatpush3.msra.mxu1 %v358_v20 }
  0x31   : > { %604 = vmatprep.subr.mxu1 %v715_v1 }
  0x32   : > { %605 = vmatpush3.msra.mxu1 %v357_v21 }
  0x33   : > { %606 = vmatprep.subr.mxu1 %v715_v1 }
  0x34   : > { %607 = vmatpush3.msra.mxu1 %v356_v22 }
  0x8b   : > { %v268_v18 = vpop.permute.xlu0 %267 }
  0x8c   : > { %v271_v19 = vsel %vm270_vm1, %v264_v17, %v268_v18 }
  0x8d   : > { %574 = vmatmul.mubr.msk.f32.vlgmr.msra.gmra.mxu0 %vm281_vm2, %v271_v19 }
 0x14d   : > { %v351_v24 = vpop.f32.mrf.mxu0 }
 0x14e   : > { %v352_v25 = vadd.f32 %v542_v23, %v351_v24 }
 0x14f   : > { %v575_v26 = vpop.f32.mrf.mxu0 }
 0x150   : > { %v355_v27 = vmax.f32 %v352_v25, 0.0 }
 0x152   : > { %609 = vmatmul.mubr.f32.vlgmr.msra.gmra.mxu1 %v355_v27 }
 0x212   : > { %v445_v29 = vpop.f32.mrf.mxu1 }
 0x213   : > { %v446_v30 = vadd.f32 %v544_v28, %v445_v29 }
 0x214   : > { %v610_v31 = vpop.f32.mrf.mxu1 }
 0x215   : > { %449 = vst.msk [vmem:[%s255_s20] sm:$0xff] %vm281_vm2, %v446_v30 }
 0x216   : > { %666 = shalt.err (!%p663_p3)
}
 0x217   : > { %s667_s12 = scalar_lea.hbm %s903_s15, 128  ;;  %s671_s16 = scalar_lea.hbm %s945_s6, 256 }
 0x218   : > { %p668_p4 = scmp.ne.s32.totalorder %s903_s15, %s667_s12  ;;  %p672_p9 = scmp.lt.s32.totalorder %s903_s15, %s945_s6 }
 0x219   : > { %p673_p10 = scmp.lt.s32.totalorder %s671_s16, %s667_s12 }
 0x21a   : > { %p669_p7 = pnand %p668_p4, %p792_p5 }
 0x21b   : > { %p674_p11 = por %p673_p10, %p672_p9 }
 0x21c   : > { %p670_p8 = pneg %p669_p7 }
 0x21e   : > { %p675_p12 = pnand %p674_p11, %p670_p8 }
 0x220   : > { %678 = shalt.err (!%p675_p12)
}
 0x221   : > { %611 = dma.vmem_to_hbm [thread:$0]  (%p792_p5), %s465_s26, 128, %s903_s15, %s451_s9  }
 0x222 PF: > { %p617_p13 = scmp.ge.s32.totalorder %s713_s24, 2  ;;  %s476_s20 = sand.u32 1, %s701_s21  }
 0x223   : > { %s477_s28 = scalar_lea.sflag [#allocation3], %s476_s20 }
 0x224   : > { %p614_p0 = pnand %p617_p13, %p796_p6 }
 0x226   : > { %p615_p1 = pneg %p614_p0 }
 0x228   : > { %696 = dma.done.wait (%p615_p1), %s477_s28, 128  }
 0x229   : > { %698 = vsyncadd (%p615_p1), %s477_s28, 4294967168  ;;  %p16_p2 = scmp.ge.s32.totalorder %s779_s27, 4   ;;  %s948_s21 = smov %s705_s22 }
 0x22a   : > { %s949_s22 = smov %s709_s23  ;;  %s950_s23 = smov %s790_s30 }
 0x22b   : > { %s951_s24 = smov %s779_s27  ;;  %18 = sbr.rel (!%p16_p2) target bundleno = 3 (0x3), region = 82 }
 0x230   :  { %482 = vsyncpa [#allocation3], 1 }
 0x231   :  { %484 = vsyncpa [#allocation3 + $0x1], 1 }

</bundles_post_ra>
